<compile_context>
chip_gen: v7x
topology: tpu7x:2x2x1
jax: 0.10.0
libtpu: 0.0.40
codegen_flags: <defaults>
</compile_context>

<pallas_src>
import functools

import jax
import jax.numpy as jnp
from jax import lax
from jax.experimental import pallas as pl
from jax.experimental.pallas import tpu as pltpu


# ---------------------------------------------------------------------------
# Kernels
# ---------------------------------------------------------------------------
def _proj_kernel_resident(x_ref, w_ref, b_ref, o_ref):
    """Weight/bias fully VMEM-resident; one fused matmul + bias per M tile.

    x_ref: (tm, K)       activation tile (native dtype)
    w_ref: (C_out, K)    full weight, nn.Linear layout (out, in)
    b_ref: (1, C_out)    full bias
    o_ref: (tm, C_out)   output tile
    """
    acc = lax.dot_general(
        x_ref[...],
        w_ref[...],
        dimension_numbers=(((1,), (1,)), ((), ())),   # contract K with K
        preferred_element_type=jnp.float32,
    )
    o_ref[...] = (acc + b_ref[...].astype(jnp.float32)).astype(o_ref.dtype)


def _proj_kernel_tiled(x_ref, w_ref, b_ref, o_ref, acc_ref):
    """General tiled path for large weights (grid = (M, N, K), K last).

    x_ref: (tm, tk), w_ref: (tn, tk), b_ref: (1, tn), o_ref/acc_ref: (tm, tn)
    """
    k = pl.program_id(2)
    partial = lax.dot_general(
        x_ref[...],
        w_ref[...],
        dimension_numbers=(((1,), (1,)), ((), ())),
        preferred_element_type=jnp.float32,
    )

    @pl.when(k == 0)
    def _():
        acc_ref[...] = partial            # direct write: no zero-init store

    @pl.when(k > 0)
    def _():
        acc_ref[...] += partial

    @pl.when(k == pl.num_programs(2) - 1)
    def _():
        out = acc_ref[...] + b_ref[...].astype(jnp.float32)
        o_ref[...] = out.astype(o_ref.dtype)


# ---------------------------------------------------------------------------
# Tiling helpers (all static / trace-time)
# ---------------------------------------------------------------------------
def _round_up(x, m):
    return ((x + m - 1) // m) * m


def _pick_tm(M):
    """Sublane-aligned M tile; prefer >=2 blocks so v7x can shard across TCs."""
    if M >= 1024:
        return 512
    if M >= 512:
        return 256
    if M >= 256:
        return 128
    if M >= 16:
        half = -(-M // 2)                 # cdiv(M, 2): split into 2 blocks
        return _round_up(half, 8)
    return _round_up(max(M, 1), 8)


def _vmem_budget(tm, K, C_out, itemsize):
    x_buf = 2 * tm * K * itemsize                     # double-buffered input
    o_buf = 2 * tm * C_out * itemsize                 # double-buffered output
    w_buf = C_out * K * itemsize + C_out * itemsize   # resident weight + bias
    needed = x_buf + o_buf + w_buf
    return int(min(max(2 * needed, 32 * 1024 * 1024), 48 * 1024 * 1024))


# ---------------------------------------------------------------------------
# Wrapper
# ---------------------------------------------------------------------------
@functools.partial(jax.jit, static_argnames=("patch_size",))
def per_patch_fc_forward(x, weight, bias, *, patch_size):
    """Per_patch_Fully_connected forward.

    x:      (..., C_in, H, W)
    weight: (C, C_in * patch_size**2)   -- PyTorch nn.Linear layout (out, in)
    bias:   (C,)
    returns (B, S, C) with S = H*W / patch_size**2
    """
    C_in, H, W = x.shape[-3], x.shape[-2], x.shape[-1]
    S = (H * W) // (patch_size * patch_size)
    K = C_in * patch_size * patch_size
    C_out = weight.shape[0]

    # torch.reshape(x, (-1, S, K)) -- raw row-major reshape (no unfold).
    x3 = x.reshape(-1, S, K)
    B = x3.shape[0]
    M = B * S
    x_flat = x3.reshape(M, K)

    # Pad M up to a multiple of the M tile (never a whole-array fallback).
    tm = _pick_tm(M)
    M_pad = _round_up(M, tm)
    if M_pad != M:
        x_flat = jnp.pad(x_flat, ((0, M_pad - M), (0, 0)))
    grid_m = M_pad // tm

    b2 = bias.reshape(1, C_out)

    itemsize = jnp.dtype(x.dtype).itemsize
    weight_bytes = K * C_out * jnp.dtype(weight.dtype).itemsize
    small_weight = weight_bytes <= 6 * 1024 * 1024     # typical patch embedding

    if small_weight:
        # ---- Fast path: W / bias VMEM-resident, grid = M tiles only. ----
        out_flat = pl.pallas_call(
            _proj_kernel_resident,
            out_shape=jax.ShapeDtypeStruct((M_pad, C_out), x.dtype),
            grid_spec=pltpu.PrefetchScalarGridSpec(
                num_scalar_prefetch=0,
                grid=(grid_m,),
                in_specs=[
                    pl.BlockSpec((tm, K), lambda i: (i, 0)),
                    pl.BlockSpec((C_out, K), lambda i: (0, 0)),   # resident
                    pl.BlockSpec((1, C_out), lambda i: (0, 0)),   # resident
                ],
                out_specs=pl.BlockSpec((tm, C_out), lambda i: (i, 0)),
            ),
            compiler_params=pltpu.CompilerParams(
                dimension_semantics=("parallel",),
                vmem_limit_bytes=_vmem_budget(tm, K, C_out, itemsize),
            ),
        )(x_flat, weight, b2)
        out_flat = out_flat[:M]
    else:
        # ---- General path: tiled (M, N, K) grid, reduction axis last. ----
        tn = 256 if C_out % 256 == 0 else 128
        C_pad = _round_up(C_out, tn)
        if K <= 2048:
            tk = _round_up(K, 128)
            K_pad = tk
        else:
            tk = 512
            K_pad = _round_up(K, tk)

        w_p, b_p = weight, b2
        if C_pad != C_out or K_pad != K:
            w_p = jnp.pad(weight, ((0, C_pad - C_out), (0, K_pad - K)))
            b_p = jnp.pad(b2, ((0, 0), (0, C_pad - C_out)))
        x_p = x_flat
        if K_pad != K:
            x_p = jnp.pad(x_flat, ((0, 0), (0, K_pad - K)))

        grid = (grid_m, C_pad // tn, K_pad // tk)
        out_flat = pl.pallas_call(
            _proj_kernel_tiled,
            out_shape=jax.ShapeDtypeStruct((M_pad, C_pad), x.dtype),
            grid_spec=pltpu.PrefetchScalarGridSpec(
                num_scalar_prefetch=0,
                grid=grid,
                in_specs=[
                    pl.BlockSpec((tm, tk), lambda i, j, k: (i, k)),
                    pl.BlockSpec((tn, tk), lambda i, j, k: (j, k)),
                    pl.BlockSpec((1, tn), lambda i, j, k: (0, j)),
                ],
                out_specs=pl.BlockSpec((tm, tn), lambda i, j, k: (i, j)),
                scratch_shapes=[pltpu.VMEM((tm, tn), jnp.float32)],
            ),
            compiler_params=pltpu.CompilerParams(
                dimension_semantics=("parallel", "parallel", "arbitrary"),
                vmem_limit_bytes=48 * 1024 * 1024,
            ),
        )(x_p, w_p, b_p)
        out_flat = out_flat[:M, :C_out]

    return out_flat.reshape(B, S, C_out)


# ---------------------------------------------------------------------------
# Reference + demo
# ---------------------------------------------------------------------------
def _reference(x, weight, bias, patch_size):
    C_in, H, W = x.shape[-3], x.shape[-2], x.shape[-1]
    S = (H * W) // (patch_size * patch_size)
    K = C_in * patch_size * patch_size
    x3 = x.reshape(-1, S, K).astype(jnp.float32)
    y = x3 @ weight.astype(jnp.float32).T + bias.astype(jnp.float32)
    return y.astype(x.dtype)


if __name__ == "__main__":
    key = jax.random.PRNGKey(0)

    # Module config: input_size=(C_in, H, W)=(4, 16, 16), patch_size=4, C=32
    B, C_in, H, W = 2, 4, 16, 16
    patch_size = 4
    C = 32
    S = (H * W) // (patch_size * patch_size)          # 16
    K = C_in * patch_size * patch_size                # 64

    kx, kw, kb = jax.random.split(key, 3)
    x = jax.random.normal(kx, (B, C_in, H, W), dtype=jnp.float32)
    # nn.Linear weight layout: (out_features, in_features)
    w = jax.random.normal(kw, (C, K), dtype=jnp.float32) * (1.0 / K) ** 0.5
    b = jax.random.normal(kb, (C,), dtype=jnp.float32) * (1.0 / K) ** 0.5

    out = per_patch_fc_forward(x, w, b, patch_size=patch_size)
    jax.block_until_ready(out)

    ref = _reference(x, w, b, patch_size)
    assert out.shape == (B, S, C), out.shape
    assert jnp.allclose(out, ref, atol=1e-5, rtol=1e-5), "mismatch vs reference"

    print("KERNEL_OK")
</pallas_src>

<mosaic_0001>
module attributes {stable_mosaic.version = 11 : i64} {
  func.func @_proj_kernel_resident(%arg0: i32, %arg1: memref<16x64xf32, #tpu.memory_space<vmem>>, %arg2: memref<32x64xf32, #tpu.memory_space<vmem>>, %arg3: memref<1x32xf32, #tpu.memory_space<vmem>>, %arg4: memref<16x32xf32, #tpu.memory_space<vmem>>) attributes {dimension_semantics = [#tpu.dimension_semantics<parallel>], iteration_bounds = array<i64: 2>, scalar_prefetch = 0 : i64, scratch_operands = 0 : i64, tpu.core_type = #tpu.core_type<tc>, window_params = [{transform_indices = @transform_0, window_bounds = array<i64: 16, 64>}, {pipeline_mode = #tpu.pipeline_mode<synchronous>, transform_indices = @transform_1, window_bounds = array<i64: 32, 64>}, {pipeline_mode = #tpu.pipeline_mode<synchronous>, transform_indices = @transform_2, window_bounds = array<i64: 1, 32>}, {transform_indices = @transform_3, window_bounds = array<i64: 16, 32>}]} {
    %c0 = arith.constant 0 : index
    %c0_0 = arith.constant 0 : index
    %0 = vector.load %arg1[%c0, %c0_0] : memref<16x64xf32, #tpu.memory_space<vmem>>, vector<16x64xf32>
    %c0_1 = arith.constant 0 : index
    %c0_2 = arith.constant 0 : index
    %1 = vector.load %arg2[%c0_1, %c0_2] : memref<32x64xf32, #tpu.memory_space<vmem>>, vector<32x64xf32>
    %cst = arith.constant dense<0.000000e+00> : vector<16x32xf32>
    %2 = tpu.matmul %0, %1, %cst {dimension_numbers = #tpu.dot_dimension_numbers<[1], [1], [0], [0], [0, 0, 1, 0], [], []>} : vector<16x64xf32>, vector<32x64xf32>, vector<16x32xf32> -> vector<16x32xf32>
    %c0_3 = arith.constant 0 : index
    %c0_4 = arith.constant 0 : index
    %3 = vector.load %arg3[%c0_3, %c0_4] : memref<1x32xf32, #tpu.memory_space<vmem>>, vector<1x32xf32>
    %4 = vector.broadcast %3 : vector<1x32xf32> to vector<16x32xf32>
    %5 = arith.addf %2, %4 : vector<16x32xf32>
    %c0_5 = arith.constant 0 : index
    %c0_6 = arith.constant 0 : index
    %6 = vector.load %arg4[%c0_5, %c0_6] : memref<16x32xf32, #tpu.memory_space<vmem>>, vector<16x32xf32>
    tpu.vector_store %arg4[%c0_5, %c0_6], %5 {strides = array<i32>} : memref<16x32xf32, #tpu.memory_space<vmem>>, vector<16x32xf32>,
    return
  }
  func.func @transform_0(%arg0: i32) -> (i32, i32) {
    %c0_i32 = arith.constant 0 : i32
    %c0_i32_0 = arith.constant 0 : i32
    return %arg0, %c0_i32 : i32, i32
  }
  func.func @transform_1(%arg0: i32) -> (i32, i32) {
    %c0_i32 = arith.constant 0 : i32
    %c0_i32_0 = arith.constant 0 : i32
    %c0_i32_1 = arith.constant 0 : i32
    return %c0_i32, %c0_i32_0 : i32, i32
  }
  func.func @transform_2(%arg0: i32) -> (i32, i32) {
    %c0_i32 = arith.constant 0 : i32
    %c0_i32_0 = arith.constant 0 : i32
    %c0_i32_1 = arith.constant 0 : i32
    return %c0_i32, %c0_i32_0 : i32, i32
  }
  func.func @transform_3(%arg0: i32) -> (i32, i32) {
    %c0_i32 = arith.constant 0 : i32
    %c0_i32_0 = arith.constant 0 : i32
    return %arg0, %c0_i32 : i32, i32
  }
}

</mosaic_0001>

<bundles_post_ra>
// kernel: per_patch_fc_forward.1
= control target key start
LH: loop header
LB: loop body
LE: loop exit
PB: predicated region body
PF: predicated region fallthrough
CT: control target
= control target key end

     0   :  { %8 = vsyncpa [#allocation3], 0  ;;  %s656_s0 = inlined_call_operand.vmem [shape: f32[32,64], index: 0, kind: input, shape index: {}]   ;;  %s657_s1 = inlined_call_operand.vmem [shape: f32[32,64], index: 1, kind: input, shape index: {}]   ;;  %s658_s2 = inlined_call_operand.vmem [shape: f32[1,32], index: 2, kind: input, shape index: {}]   ;;  %s659_s3 = inlined_call_operand.hbm [shape: f32[32,32], index: 3, kind: output, shape index: {}]  }
   0x1   :  { %10 = vsyncpa [#allocation3 + $0x1], 0  ;;  %s535_s12 = smov 0   ;;  %s537_s13 = smov 0  }
   0x2   :  { %s539_s14 = smov 0   ;;  %s541_s15 = smov 0  }
   0x3 LB: > { %s556_s16 = sadd.s32 4294967295, %s510_s15   ;;  %s358_s17 = sadd.s32 4294967294, %s510_s15   ;;  %s510_s15 = sphi %s541_s15, %s665_s15   ;;  %s506_s14 = sphi %s539_s14, %s664_s14   ;;  %s502_s13 = sphi %s537_s13, %s663_s13   ;;  %s498_s12 = sphi %s535_s12, %s662_s12  }
   0x4   : > { %s560_s18 = sadd.s32 1, %s510_s15   ;;  %s91_s19 = sadd.s32 1, %s506_s14 }
   0x5   : > { %s88_s20 = ssub.s32 %s510_s15, %s560_s18  ;;  %p101_p0 = scmp.ne.s32.totalorder %s506_s14, %s502_s13 }
   0x6   : > { %p89_p1 = scmp.eq.s32.totalorder %s88_s20, 0  ;;  %p102_p2 = scmp.eq.s32.totalorder %s556_s16, 1 }
   0x7   : > { %p107_p3 = scmp.ne.s32.totalorder %s502_s13, %s498_s12  ;;  %p108_p4 = scmp.eq.s32.totalorder %s358_s17, 1 }
   0x8   : > { %s571_s21 = scalar_select %p89_p1, %s506_s14, %s91_s19  }
   0x9   : > { %p573_p5 = por %p102_p2, %p101_p0  ;;  %p577_p6 = por %p108_p4, %p107_p3 }
   0xa   : > { %p361_p7 = scmp.ge.s32.totalorder %s510_s15, 1  ;;  %p141_p8 = scmp.lt.s32.totalorder %s510_s15, 3 }
   0xc   : > { %p142_p9 = pnand %p361_p7, %p141_p8 }
   0xd   : > { %v174_v0 = vld [vmem:[%s657_s1] sm:$0xff] (!%p142_p9)  ;;  %v175_v1 = vld [vmem:[%s657_s1 + $0x8] sm:$0xff] (!%p142_p9)  ;;  %vm185_vm0 = vcmask (!%p142_p9), 523264   ;;  %v176_v2 = vld [vmem:[%s657_s1 + $0x10] sm:$0xff] (!%p142_p9)  ;;  %s363_s30 = sshll.u32 (!%p142_p9), %s556_s16, 1  ;;  %s162_s10 = sand.u32 (!%p142_p9), 1, %s502_s13  }
   0xe   : > { %145 = sbr.rel (%p142_p9) target bundleno = 262 (0x106), region = 32  ;;  %v395_v3 = vpack.c.bf16 (!%p142_p9), %v175_v1, %v174_v0  ;;  %vm396_vm1 = vmpackc.low (!%p142_p9), %vm185_vm0, %vm185_vm0  ;;  %v177_v4 = vld [vmem:[%s657_s1 + $0x18] sm:$0xff] (!%p142_p9)  ;;  %p166_p10 = scmp.lt.s32.totalorder (!%p142_p9), %s363_s30, 3  ;;  %v365_v8 = vld [vmem:[%s658_s2] ss:$0 sm:$0xff] (!%p142_p9)  ;;  %vm279_vm2 = vcmask (!%p142_p9), 261120  }
   0xf   : > { %v401_v5 = vpack.c.bf16 (!%p142_p9), %v177_v4, %v176_v2  ;;  %s362_s11 = sshll.u32 (!%p142_p9), %s162_s10, 4  ;;  %s377_s25 = sshll.u32 (!%p142_p9), %s556_s16, 8 }
  0x10   : > { %397 = vmatprep.subr.msk.bf16.mxu0 (!%p142_p9), %vm396_vm1, %v395_v3  ;;  %s164_s20 = scalar_lea.vmem (!%p142_p9), [#allocation2], %s362_s11  ;;  %s613_s28 = scalar_lea.hbm (!%p142_p9), %s659_s3, %s377_s25 }
  0x11   : > { %400 = vmatpush3.bf16.xpose.msk.msra.mxu0 (!%p142_p9), %vm396_vm1, %v395_v3  ;;  %s296_s24 = sshll.u32 (!%p142_p9), %s164_s20, 4  ;;  %s615_s29 = scalar_lea.sflag (!%p142_p9), [#allocation3], %s162_s10  ;;  %s608_s24 = int_to_ptr.vmem [resolvable:$true] %s296_s24 }
  0x12   : > { %403 = vmatprep.subr.msk.bf16.mxu0 (!%p142_p9), %vm396_vm1, %v401_v5  ;;  %s448_s16 = scalar_lea.vmem (!%p142_p9), %s608_s24, 256 }
  0x13   : > { %p449_p11 = scmp.ne.s32.totalorder (!%p142_p9), %s608_s24, %s448_s16 }
  0x15   : > { %s667_s30 = smov (!%p166_p10, %s363_s30), 3  ;;  %p450_p12 = pnand %p449_p11, %p573_p5 }
  0x16   : > { %s364_s6 = sshll.u32 %s667_s30, 3  ;;  %s512_s30 = smov [#allocation2]  }
  0x17   : > { %s169_s9 = scalar_lea.vmem %s656_s0, %s364_s6  ;;  %p451_p13 = pneg %p450_p12 }
  0x18   : > { %v172_v6 = vld [vmem:[%s169_s9] sm:$0xff]  ;;  %v173_v7 = vld [vmem:[%s169_s9 + $0x8] sm:$0xff]  ;;  %s452_s4 = sshll.u32 %s512_s30, 4  ;;  %s453_s4 = int_to_ptr.vmem [resolvable:$false] %s452_s4 }
  0x19   : > { %392 = vmatprep.mubr.msk.f32.mxu0 %vm185_vm0, %v172_v6  ;;  %406 = vmatpush3.bf16.xpose.msk.msra.mxu0 %vm396_vm1, %v401_v5  ;;  %s454_s5 = scalar_lea.vmem %s453_s4, 512  ;;  %p455_p0 = scmp.lt.s32.totalorder %s608_s24, %s453_s4 }
  0x1a   : > { %p456_p1 = scmp.lt.s32.totalorder %s454_s5, %s448_s16 }
  0x1c   : > { %p457_p2 = por %p456_p1, %p455_p0 }
  0x1e   : > { %p458_p3 = pnand %p457_p2, %p451_p13 }
  0x20   : > { %393 = vmatmul.mubr.msk.f32.vlgmr.msra.gmra.mrb[0].mxu0 %vm185_vm0, %v173_v7 }
  0xf3   : > { %v394_v9 = vpop.f32.mrb[0].mxu0 }
  0xf4   : > { %v276_v10 = vadd.f32 %v394_v9, %v365_v8  ;;  %v270_v11 = vpop.f32.mrb[1].mxu0 }
  0xf5   : > { %v271_v12 = vadd.f32 %v365_v8, %v270_v11 }
  0xf6   : > { %281 = vst.msk [vmem:[%s164_s20 + $0x8] sm:$0xff] %vm279_vm2, %v276_v10 }
  0xf7   : > { %280 = vst.msk [vmem:[%s164_s20] sm:$0xff] %vm279_vm2, %v271_v12 }
  0xf8   : > { %461 = shalt.err (!%p458_p3)
}
  0xf9   : > { %s462_s6 = scalar_lea.hbm %s613_s28, 256  ;;  %s466_s9 = scalar_lea.hbm %s659_s3, 512 }
  0xfa   : > { %p463_p4 = scmp.ne.s32.totalorder %s613_s28, %s462_s6  ;;  %p467_p9 = scmp.lt.u32.totalorder %s613_s28, %s659_s3 }
  0xfb   : > { %p468_p10 = scmp.lt.u32.totalorder %s466_s9, %s462_s6  ;;  %p470_p12 = scmp.lt.u32.totalorder %s462_s6, %s613_s28 }
  0xfc   : > { %p464_p7 = pnand %p463_p4, %p573_p5 }
  0xfd   : > { %p469_p11 = por %p468_p10, %p467_p9 }
  0xfe   : > { %p465_p8 = pneg %p464_p7 }
  0xff   : > { %p471_p13 = por %p470_p12, %p469_p11 }
 0x101   : > { %p472_p0 = pnand %p471_p13, %p465_p8 }
 0x103   : > { %475 = shalt.err (!%p472_p0)
}
 0x104   : > { %s513_s17 = smov 128   ;;  %s514_s19 = smov 8  }
 0x105   : > { %407 = dma.vmem_to_hbm [thread:$0]  (%p573_p5), %s608_s24, 256, %s613_s28, %s615_s29, %s513_s17, %s513_s17, %s514_s19  }
 0x106 PF: > { %p413_p1 = scmp.ge.s32.totalorder %s510_s15, 2  ;;  %s311_s20 = sand.u32 1, %s498_s12  }
 0x107   : > { %s312_s25 = scalar_lea.sflag [#allocation3], %s311_s20 }
 0x108   : > { %p410_p2 = pnand %p413_p1, %p577_p6 }
 0x10a   : > { %493 = dma.done.wait (!%p410_p2), %s312_s25, 256  }
 0x10b   : > { %495 = vsyncadd (!%p410_p2), %s312_s25, 4294967040  ;;  %p13_p3 = scmp.ge.s32.totalorder %s560_s18, 4   ;;  %s662_s12 = smov %s502_s13 }
 0x10c   : > { %s663_s13 = smov %s506_s14  ;;  %s664_s14 = smov %s571_s21 }
 0x10d   : > { %s665_s15 = smov %s560_s18  ;;  %15 = sbr.rel (!%p13_p3) target bundleno = 3 (0x3), region = 67 }
 0x114   :  { %317 = vsyncpa [#allocation3], 1 }
 0x115   :  { %319 = vsyncpa [#allocation3 + $0x1], 1 }

</bundles_post_ra>
